<compile_context>
chip_gen: v6e
topology: v6e:2x2x1
jax: 0.10.0
libtpu: 0.0.40
codegen_flags: <defaults>
</compile_context>

<pallas_src>
import jax
import jax.numpy as jnp
from jax.experimental import pallas as pl
from jax.experimental.pallas import tpu as pltpu

LANE = 128


def _round_up(x, m):
    return (x + m - 1) // m * m


def mlp_kernel(x_ref, w1_ref, b1_ref, w2_ref, b2_ref, w3_ref, b3_ref, o_ref):
    """Fused 3-layer MLP forward for one batch tile.

    Matmuls run on the MXU in the (possibly bf16) weight dtype with f32
    accumulation; bias add and tanh stay in f32 (VPU/EUP).
    """
    wdt = w1_ref.dtype
    x = x_ref[...]
    h1 = jnp.tanh(
        jnp.dot(x, w1_ref[...], preferred_element_type=jnp.float32) + b1_ref[...]
    )
    h2 = jnp.tanh(
        jnp.dot(h1.astype(wdt), w2_ref[...], preferred_element_type=jnp.float32)
        + b2_ref[...]
    )
    out = (
        jnp.dot(h2.astype(wdt), w3_ref[...], preferred_element_type=jnp.float32)
        + b3_ref[...]
    )
    o_ref[...] = out.astype(o_ref.dtype)


def _pick_tile_b(B, requested):
    """Batch tile: multiple of 8, capped at 256 (vreg-pressure cap), divides B."""
    if requested is not None:
        tile_b = requested
    else:
        tile_b = B
        for cand in (256, 512, 128, 64, 32, 16, 8):
            if cand <= B and B % cand == 0:
                tile_b = cand
                break
    assert B % tile_b == 0, "tile_b must divide B"
    assert tile_b % 8 == 0 or tile_b == B, "tile_b must be a multiple of 8 (sublane)"
    return tile_b


def mlp_forward(x, params, *, tile_b=None, compute_dtype=jnp.bfloat16):
    """Run the fused MLP kernel.

    x:      [B, idim] float32
    params: ((w1, b1), (w2, b2), (w3, b3)) with w_i [in, out], b_i [1, out]
    compute_dtype: matmul-operand dtype (bf16 for speed, f32 for exactness).
    """
    (w1, b1), (w2, b2), (w3, b3) = params
    B, idim = x.shape
    h1 = w1.shape[1]
    h2 = w2.shape[1]
    odim = w3.shape[1]
    out_dtype = x.dtype

    tile_b = _pick_tile_b(B, tile_b)
    grid = (B // tile_b,)

    # --- lane-dense output: zero-pad the final layer to a multiple of 128 lanes.
    opad = max(LANE, _round_up(odim, LANE))
    if opad != odim:
        w3p = jnp.zeros((h2, opad), w3.dtype).at[:, :odim].set(w3)
        b3p = jnp.zeros((1, opad), b3.dtype).at[:, :odim].set(b3)
    else:
        w3p, b3p = w3, b3

    # --- cast matmul operands once in the wrapper (halves x/weight DMA bytes
    #     when compute_dtype is bf16); biases stay f32 for the f32 bias-add.
    cdt = jnp.dtype(compute_dtype)
    x_c = x.astype(cdt)
    w1c, w2c, w3c = w1.astype(cdt), w2.astype(cdt), w3p.astype(cdt)
    b1c, b2c, b3c = (
        b1.astype(jnp.float32),
        b2.astype(jnp.float32),
        b3p.astype(jnp.float32),
    )

    # --- explicit VMEM budget (double-buffered x/out tiles + resident weights
    #     + f32 intermediates), kept conservative for v7x's 64 MiB VMEM.
    est_bytes = (
        2 * tile_b * idim * cdt.itemsize                    # x tiles (double-buffered)
        + 2 * tile_b * opad * jnp.dtype(out_dtype).itemsize # out tiles (double-buffered)
        + (idim * h1 + h1 * h2 + h2 * opad) * cdt.itemsize  # resident weights
        + (h1 + h2 + opad) * 4                              # resident biases (f32)
        + tile_b * (h1 + h2 + opad) * 4                     # f32 intermediates
    )
    assert est_bytes < (48 << 20), "tile_b too large for v7x VMEM budget"
    vmem_limit = int(min(48 << 20, max(32 << 20, 2 * est_bytes)))

    full2d = lambda r, c: pl.BlockSpec((r, c), lambda i: (0, 0))

    out_padded = pl.pallas_call(
        mlp_kernel,
        out_shape=jax.ShapeDtypeStruct((B, opad), out_dtype),
        grid_spec=pltpu.PrefetchScalarGridSpec(
            num_scalar_prefetch=0,
            grid=grid,
            in_specs=[
                pl.BlockSpec((tile_b, idim), lambda i: (i, 0)),  # streamed x tile
                full2d(idim, h1), full2d(1, h1),                 # layer 1 (resident)
                full2d(h1, h2),   full2d(1, h2),                 # layer 2 (resident)
                full2d(h2, opad), full2d(1, opad),               # output layer (padded)
            ],
            out_specs=pl.BlockSpec((tile_b, opad), lambda i: (i, 0)),
        ),
        compiler_params=pltpu.CompilerParams(
            dimension_semantics=("parallel",),
            vmem_limit_bytes=vmem_limit,
        ),
    )(x_c, w1c, b1c, w2c, b2c, w3c, b3c)

    return out_padded[:, :odim] if opad != odim else out_padded


def init_mlp_params(key, idim, nhid, odim):
    """Deterministic init mimicking nn.Linear's U(-1/sqrt(in), 1/sqrt(in))."""
    dims = [idim] + list(nhid) + [odim]
    params = []
    for d_in, d_out in zip(dims[:-1], dims[1:]):
        key, kw, kb = jax.random.split(key, 3)
        bound = 1.0 / jnp.sqrt(d_in)
        w = jax.random.uniform(kw, (d_in, d_out), jnp.float32, -bound, bound)
        b = jax.random.uniform(kb, (1, d_out), jnp.float32, -bound, bound)
        params.append((w, b))
    return tuple(params)


def mlp_reference(x, params):
    """Plain-JAX reference of the same forward pass (for verification)."""
    (w1, b1), (w2, b2), (w3, b3) = params
    hp = jax.lax.Precision.HIGHEST
    h = jnp.tanh(jnp.dot(x, w1, precision=hp) + b1)
    h = jnp.tanh(jnp.dot(h, w2, precision=hp) + b2)
    return jnp.dot(h, w3, precision=hp) + b3


if __name__ == "__main__":
    # Shapes consistent with MLP(idim, odim=2, nhid=[64, 32], activation='TANH').
    # B=1024 with tile_b=256 -> grid=(4,): pipelined + megacore-shardable.
    B, idim, nhid, odim = 1024, 32, (64, 32), 2

    key = jax.random.PRNGKey(0)
    key, kx = jax.random.split(key)
    x = jax.random.normal(kx, (B, idim), dtype=jnp.float32)
    params = init_mlp_params(key, idim, nhid, odim)

    ref = mlp_reference(x, params)

    # Exact-ish f32 compute path: tight correctness check.
    out_f32 = jax.block_until_ready(
        mlp_forward(x, params, compute_dtype=jnp.float32)
    )
    assert out_f32.shape == (B, odim)
    assert jnp.allclose(out_f32, ref, atol=2e-4, rtol=2e-4), "f32 path mismatch"

    # Fast bf16-operand path (default): loose tolerance vs f32 reference.
    out_bf16 = jax.block_until_ready(mlp_forward(x, params))
    assert out_bf16.shape == (B, odim)
    assert jnp.allclose(out_bf16, ref, atol=1e-1, rtol=1e-1), "bf16 path mismatch"

    print("KERNEL_OK")
</pallas_src>

<mosaic_0001>
module attributes {stable_mosaic.version = 11 : i64} {
  func.func @mlp_kernel(%arg0: i32, %arg1: memref<256x32xf32, #tpu.memory_space<vmem>>, %arg2: memref<32x64xf32, #tpu.memory_space<vmem>>, %arg3: memref<1x64xf32, #tpu.memory_space<vmem>>, %arg4: memref<64x32xf32, #tpu.memory_space<vmem>>, %arg5: memref<1x32xf32, #tpu.memory_space<vmem>>, %arg6: memref<32x128xf32, #tpu.memory_space<vmem>>, %arg7: memref<1x128xf32, #tpu.memory_space<vmem>>, %arg8: memref<256x128xf32, #tpu.memory_space<vmem>>) attributes {dimension_semantics = [#tpu.dimension_semantics<parallel>], iteration_bounds = array<i64: 4>, scalar_prefetch = 0 : i64, scratch_operands = 0 : i64, tpu.core_type = #tpu.core_type<tc>, window_params = [{transform_indices = @transform_0, window_bounds = array<i64: 256, 32>}, {pipeline_mode = #tpu.pipeline_mode<synchronous>, transform_indices = @transform_1, window_bounds = array<i64: 32, 64>}, {pipeline_mode = #tpu.pipeline_mode<synchronous>, transform_indices = @transform_2, window_bounds = array<i64: 1, 64>}, {pipeline_mode = #tpu.pipeline_mode<synchronous>, transform_indices = @transform_3, window_bounds = array<i64: 64, 32>}, {pipeline_mode = #tpu.pipeline_mode<synchronous>, transform_indices = @transform_4, window_bounds = array<i64: 1, 32>}, {pipeline_mode = #tpu.pipeline_mode<synchronous>, transform_indices = @transform_5, window_bounds = array<i64: 32, 128>}, {pipeline_mode = #tpu.pipeline_mode<synchronous>, transform_indices = @transform_6, window_bounds = array<i64: 1, 128>}, {transform_indices = @transform_7, window_bounds = array<i64: 256, 128>}]} {
    %c0 = arith.constant 0 : index
    %c0_0 = arith.constant 0 : index
    %0 = vector.load %arg1[%c0, %c0_0] : memref<256x32xf32, #tpu.memory_space<vmem>>, vector<256x32xf32>
    %c0_1 = arith.constant 0 : index
    %c0_2 = arith.constant 0 : index
    %1 = vector.load %arg2[%c0_1, %c0_2] : memref<32x64xf32, #tpu.memory_space<vmem>>, vector<32x64xf32>
    %cst = arith.constant dense<0.000000e+00> : vector<256x64xf32>
    %2 = tpu.matmul %0, %1, %cst {dimension_numbers = #tpu.dot_dimension_numbers<[1], [0], [0], [1], [0, 0, 1, 1], [], []>} : vector<256x32xf32>, vector<32x64xf32>, vector<256x64xf32> -> vector<256x64xf32>
    %c0_3 = arith.constant 0 : index
    %c0_4 = arith.constant 0 : index
    %3 = vector.load %arg3[%c0_3, %c0_4] : memref<1x64xf32, #tpu.memory_space<vmem>>, vector<1x64xf32>
    %4 = vector.broadcast %3 : vector<1x64xf32> to vector<256x64xf32>
    %5 = arith.addf %2, %4 : vector<256x64xf32>
    %6 = math.tanh %5 : vector<256x64xf32>
    %c0_5 = arith.constant 0 : index
    %c0_6 = arith.constant 0 : index
    %7 = vector.load %arg4[%c0_5, %c0_6] : memref<64x32xf32, #tpu.memory_space<vmem>>, vector<64x32xf32>
    %cst_7 = arith.constant dense<0.000000e+00> : vector<256x32xf32>
    %8 = tpu.matmul %6, %7, %cst_7 {dimension_numbers = #tpu.dot_dimension_numbers<[1], [0], [0], [1], [0, 0, 1, 1], [], []>} : vector<256x64xf32>, vector<64x32xf32>, vector<256x32xf32> -> vector<256x32xf32>
    %c0_8 = arith.constant 0 : index
    %c0_9 = arith.constant 0 : index
    %9 = vector.load %arg5[%c0_8, %c0_9] : memref<1x32xf32, #tpu.memory_space<vmem>>, vector<1x32xf32>
    %10 = vector.broadcast %9 : vector<1x32xf32> to vector<256x32xf32>
    %11 = arith.addf %8, %10 : vector<256x32xf32>
    %12 = math.tanh %11 : vector<256x32xf32>
    %c0_10 = arith.constant 0 : index
    %c0_11 = arith.constant 0 : index
    %13 = vector.load %arg6[%c0_10, %c0_11] : memref<32x128xf32, #tpu.memory_space<vmem>>, vector<32x128xf32>
    %cst_12 = arith.constant dense<0.000000e+00> : vector<256x128xf32>
    %14 = tpu.matmul %12, %13, %cst_12 {dimension_numbers = #tpu.dot_dimension_numbers<[1], [0], [0], [1], [0, 0, 1, 1], [], []>} : vector<256x32xf32>, vector<32x128xf32>, vector<256x128xf32> -> vector<256x128xf32>
    %c0_13 = arith.constant 0 : index
    %c0_14 = arith.constant 0 : index
    %15 = vector.load %arg7[%c0_13, %c0_14] : memref<1x128xf32, #tpu.memory_space<vmem>>, vector<1x128xf32>
    %16 = vector.broadcast %15 : vector<1x128xf32> to vector<256x128xf32>
    %17 = arith.addf %14, %16 : vector<256x128xf32>
    %c0_15 = arith.constant 0 : index
    %c0_16 = arith.constant 0 : index
    %18 = vector.load %arg8[%c0_15, %c0_16] : memref<256x128xf32, #tpu.memory_space<vmem>>, vector<256x128xf32>
    tpu.vector_store %arg8[%c0_15, %c0_16], %17 {strides = array<i32>} : memref<256x128xf32, #tpu.memory_space<vmem>>, vector<256x128xf32>,
    return
  }
  func.func @transform_0(%arg0: i32) -> (i32, i32) {
    %c0_i32 = arith.constant 0 : i32
    %c0_i32_0 = arith.constant 0 : i32
    return %arg0, %c0_i32 : i32, i32
  }
  func.func @transform_1(%arg0: i32) -> (i32, i32) {
    %c0_i32 = arith.constant 0 : i32
    %c0_i32_0 = arith.constant 0 : i32
    %c0_i32_1 = arith.constant 0 : i32
    return %c0_i32, %c0_i32_0 : i32, i32
  }
  func.func @transform_2(%arg0: i32) -> (i32, i32) {
    %c0_i32 = arith.constant 0 : i32
    %c0_i32_0 = arith.constant 0 : i32
    %c0_i32_1 = arith.constant 0 : i32
    return %c0_i32, %c0_i32_0 : i32, i32
  }
  func.func @transform_3(%arg0: i32) -> (i32, i32) {
    %c0_i32 = arith.constant 0 : i32
    %c0_i32_0 = arith.constant 0 : i32
    %c0_i32_1 = arith.constant 0 : i32
    return %c0_i32, %c0_i32_0 : i32, i32
  }
  func.func @transform_4(%arg0: i32) -> (i32, i32) {
    %c0_i32 = arith.constant 0 : i32
    %c0_i32_0 = arith.constant 0 : i32
    %c0_i32_1 = arith.constant 0 : i32
    return %c0_i32, %c0_i32_0 : i32, i32
  }
  func.func @transform_5(%arg0: i32) -> (i32, i32) {
    %c0_i32 = arith.constant 0 : i32
    %c0_i32_0 = arith.constant 0 : i32
    %c0_i32_1 = arith.constant 0 : i32
    return %c0_i32, %c0_i32_0 : i32, i32
  }
  func.func @transform_6(%arg0: i32) -> (i32, i32) {
    %c0_i32 = arith.constant 0 : i32
    %c0_i32_0 = arith.constant 0 : i32
    %c0_i32_1 = arith.constant 0 : i32
    return %c0_i32, %c0_i32_0 : i32, i32
  }
  func.func @transform_7(%arg0: i32) -> (i32, i32) {
    %c0_i32 = arith.constant 0 : i32
    %c0_i32_0 = arith.constant 0 : i32
    return %arg0, %c0_i32 : i32, i32
  }
}

</mosaic_0001>

<bundles_post_ra>
// kernel: tpu_custom_call.1
= control target key start
LH: loop header
LB: loop body
LE: loop exit
PB: predicated region body
PF: predicated region fallthrough
CT: control target
= control target key end

     0   :  { %12 = vsyncpa [#allocation3], 0  ;;  %s2609_s0 = inlined_call_operand.vmem [shape: f32[1024,32], index: 0, kind: input, shape index: {}]   ;;  %s2610_s1 = inlined_call_operand.vmem [shape: f32[32,64], index: 1, kind: input, shape index: {}]   ;;  %s2611_s2 = inlined_call_operand.vmem [shape: f32[1,64], index: 2, kind: input, shape index: {}]   ;;  %s2612_s3 = inlined_call_operand.vmem [shape: f32[64,32], index: 3, kind: input, shape index: {}]   ;;  %s2613_s4 = inlined_call_operand.vmem [shape: f32[1,32], index: 4, kind: input, shape index: {}]   ;;  %s2614_s5 = inlined_call_operand.vmem [shape: f32[32,128], index: 5, kind: input, shape index: {}]   ;;  %s2615_s6 = inlined_call_operand.vmem [shape: f32[1,128], index: 6, kind: input, shape index: {}]   ;;  %s2616_s7 = inlined_call_operand.hbm [shape: f32[1024,128], index: 7, kind: output, shape index: {}]  }
   0x1   :  { %14 = vsyncpa [#allocation3 + $0x1], 0  ;;  %s2168_s24 = smov 0   ;;  %s2170_s25 = smov 0  }
   0x2   :  { %s2172_s26 = smov 0   ;;  %s2174_s27 = smov 0  }
   0x3 LB: > { %s2189_s28 = sadd.s32 4294967295, %s2123_s27   ;;  %s1486_s29 = sadd.s32 4294967294, %s2123_s27   ;;  %s2123_s27 = sphi %s2174_s27, %s2622_s27   ;;  %s2119_s26 = sphi %s2172_s26, %s2621_s26   ;;  %s2115_s25 = sphi %s2170_s25, %s2620_s25   ;;  %s2111_s24 = sphi %s2168_s24, %s2619_s24  }
   0x4   : > { %s2193_s30 = sadd.s32 1, %s2123_s27   ;;  %s179_s8 = sadd.s32 1, %s2119_s26 }
   0x5   : > { %s176_s9 = ssub.s32 %s2123_s27, %s2193_s30  ;;  %p189_p0 = scmp.ne.s32.totalorder %s2119_s26, %s2115_s25 }
   0x6   : > { %p177_p1 = scmp.eq.s32.totalorder %s176_s9, 0  ;;  %p190_p2 = scmp.eq.s32.totalorder %s2189_s28, 3 }
   0x7   : > { %p195_p3 = scmp.ne.s32.totalorder %s2115_s25, %s2111_s24  ;;  %p196_p4 = scmp.eq.s32.totalorder %s1486_s29, 3 }
   0x8   : > { %s2204_s10 = scalar_select %p177_p1, %s2119_s26, %s179_s8  }
   0x9   : > { %p2206_p5 = por %p190_p2, %p189_p0  ;;  %p2210_p6 = por %p196_p4, %p195_p3 }
   0xa   : > { %p1489_p7 = scmp.ge.s32.totalorder %s2123_s27, 1  ;;  %p241_p8 = scmp.lt.s32.totalorder %s2123_s27, 5 }
   0xc   : > { %p242_p9 = pnand %p1489_p7, %p241_p8 }
   0xd   : > { %s1491_s17 = sshll.u32 (!%p242_p9), %s2189_s28, 5  ;;  %s2125_s23 = smov (!%p242_p9), [#allocation2]  }
   0xe   : > { %245 = sbr.rel (%p242_p9) target bundleno = 723 (0x2d3), region = 48  ;;  %p274_p10 = scmp.lt.s32.totalorder (!%p242_p9), %s1491_s17, 127 }
   0xf   : > { %s2067_s29 = sshll.u32 (!%p242_p9), %s2125_s23, 4  ;;  %s2068_s29 = int_to_ptr.vmem [resolvable:$false] %s2067_s29 }
  0x10   : > { %s2069_s9 = scalar_lea.vmem (!%p242_p9), %s2068_s29, 8192 }
  0x13   : > { %v315_v0 = vld [vmem:[%s2610_s1 + $0x18] sm:$0xff]  ;;  %v314_v1 = vld [vmem:[%s2610_s1 + $0x10] sm:$0xff]  ;;  %v313_v2 = vld [vmem:[%s2610_s1 + $0x8] sm:$0xff]  ;;  %s2624_s17 = smov (!%p274_p10, %s1491_s17), 127  ;;  %vm323_vm0 = vcmask 261120   ;;  %vm692_vm1 = vcmask 523264  }
  0x14   : > { %1710 = vmatprep.subr.mxu0 %v315_v0  ;;  %1886 = vmatprep.subr.mxu1 %v315_v0  ;;  %v312_v3 = vld [vmem:[%s2610_s1] sm:$0xff]  ;;  %s1492_s22 = sshll.u32 %s2624_s17, 3  ;;  %v684_v4 = vld [vmem:[%s2612_s3 + $0x38] sm:$0xff]  ;;  %v683_v13 = vld [vmem:[%s2612_s3 + $0x30] sm:$0xff]  ;;  %s1597_s17 = sshll.u32 %s2189_s28, 12 }
  0x15   : > { %1711 = vmatpush3.msra.mxu0 %v315_v0  ;;  %1890 = vmatpush3.msra.mxu1 %v315_v0  ;;  %s2232_s8 = scalar_lea.vmem %s2609_s0, %s1492_s22  ;;  %v682_v18 = vld [vmem:[%s2612_s3 + $0x28] sm:$0xff]  ;;  %v681_v20 = vld [vmem:[%s2612_s3 + $0x20] sm:$0xff]  ;;  %v680_v40 = vld [vmem:[%s2612_s3 + $0x18] sm:$0xff]  ;;  %s2560_s21 = scalar_lea.hbm %s2616_s7, %s1597_s17 }
  0x16   : > { %1712 = vmatprep.subr.mxu0 %v314_v1  ;;  %1887 = vmatprep.subr.mxu1 %v314_v1  ;;  %v280_v5 = vld [vmem:[%s2232_s8] sm:$0xff]  ;;  %v281_v6 = vld [vmem:[%s2232_s8 + $0x8] sm:$0xff]  ;;  %v282_v7 = vld [vmem:[%s2232_s8 + $0x10] sm:$0xff] }
  0x17   : > { %1713 = vmatpush3.msra.mxu0 %v314_v1  ;;  %1891 = vmatpush3.msra.mxu1 %v314_v1  ;;  %v283_v8 = vld [vmem:[%s2232_s8 + $0x18] sm:$0xff]  ;;  %v284_v9 = vld [vmem:[%s2232_s8 + $0x20] sm:$0xff]  ;;  %v297_v11 = vld [vmem:[%s2232_s8 + $0x88] sm:$0xff] }
  0x18   : > { %1714 = vmatprep.subr.mxu0 %v313_v2  ;;  %1888 = vmatprep.subr.mxu1 %v313_v2  ;;  %v296_v10 = vld [vmem:[%s2232_s8 + $0x80] sm:$0xff]  ;;  %v298_v12 = vld [vmem:[%s2232_s8 + $0x90] sm:$0xff]  ;;  %v285_v14 = vld [vmem:[%s2232_s8 + $0x28] sm:$0xff] }
  0x19   : > { %1715 = vmatpush3.msra.mxu0 %v313_v2  ;;  %1892 = vmatpush3.msra.mxu1 %v313_v2  ;;  %v286_v15 = vld [vmem:[%s2232_s8 + $0x30] sm:$0xff]  ;;  %v299_v16 = vld [vmem:[%s2232_s8 + $0x98] sm:$0xff]  ;;  %v300_v17 = vld [vmem:[%s2232_s8 + $0xa0] sm:$0xff] }
  0x1a   : > { %1716 = vmatprep.subr.mxu0 %v312_v3  ;;  %1889 = vmatprep.subr.mxu1 %v312_v3  ;;  %v287_v19 = vld [vmem:[%s2232_s8 + $0x38] sm:$0xff]  ;;  %v288_v21 = vld [vmem:[%s2232_s8 + $0x40] sm:$0xff]  ;;  %v301_v22 = vld [vmem:[%s2232_s8 + $0xa8] sm:$0xff] }
  0x1b   : > { %1717 = vmatpush3.msra.mxu0 %v312_v3  ;;  %1718 = vmatprep.mubr.msk.f32.mxu0 %vm323_vm0, %v280_v5  ;;  %v302_v23 = vld [vmem:[%s2232_s8 + $0xb0] sm:$0xff]  ;;  %v289_v24 = vld [vmem:[%s2232_s8 + $0x48] sm:$0xff]  ;;  %v303_v26 = vld [vmem:[%s2232_s8 + $0xb8] sm:$0xff] }
  0x1c   : > { %1719 = vmatmul.mubr.msk.f32.vlgmr.msra.gmra.mxu0 %vm323_vm0, %v281_v6  ;;  %1893 = vmatpush3.msra.mxu1 %v312_v3  ;;  %v290_v25 = vld [vmem:[%s2232_s8 + $0x50] sm:$0xff]  ;;  %v304_v27 = vld [vmem:[%s2232_s8 + $0xc0] sm:$0xff]  ;;  %v291_v28 = vld [vmem:[%s2232_s8 + $0x58] sm:$0xff] }
  0x1d   : > { %1721 = vmatprep.mubr.msk.f32.mxu0 %vm323_vm0, %v282_v7  ;;  %1766 = vmatprep.subr.mxu1 %v684_v4  ;;  %v292_v29 = vld [vmem:[%s2232_s8 + $0x60] sm:$0xff]  ;;  %v305_v30 = vld [vmem:[%s2232_s8 + $0xc8] sm:$0xff]  ;;  %v306_v31 = vld [vmem:[%s2232_s8 + $0xd0] sm:$0xff] }
  0x1e   : > { %1742 = vmatprep.mubr.msk.f32.mxu1 %vm323_vm0, %v296_v10  ;;  %v293_v32 = vld [vmem:[%s2232_s8 + $0x68] sm:$0xff]  ;;  %v294_v33 = vld [vmem:[%s2232_s8 + $0x70] sm:$0xff]  ;;  %v307_v34 = vld [vmem:[%s2232_s8 + $0xd8] sm:$0xff] }
  0x1f   : > { %1743 = vmatmul.mubr.msk.f32.vlgmr.msra.gmra.mxu1 %vm323_vm0, %v297_v11  ;;  %v308_v35 = vld [vmem:[%s2232_s8 + $0xe0] sm:$0xff]  ;;  %v295_v36 = vld [vmem:[%s2232_s8 + $0x78] sm:$0xff]  ;;  %v309_v37 = vld [vmem:[%s2232_s8 + $0xe8] sm:$0xff] }
  0x20   : > { %1722 = vmatmul.mubr.msk.f32.gmra.mxu0 %vm323_vm0, %v283_v8  ;;  %1745 = vmatprep.mubr.msk.f32.mxu1 %vm323_vm0, %v298_v12  ;;  %v310_v38 = vld [vmem:[%s2232_s8 + $0xf0] sm:$0xff]  ;;  %v311_v39 = vld [vmem:[%s2232_s8 + $0xf8] sm:$0xff]  ;;  %v678_v42 = vld [vmem:[%s2612_s3 + $0x8] sm:$0xff]  ;;  %s270_s8 = sand.u32 1, %s2115_s25  }
  0x21   : > { %1724 = vmatprep.mubr.msk.f32.mxu0 %vm323_vm0, %v284_v9  ;;  %1767 = vmatpush3.msra.mxu1 %v684_v4  ;;  %v679_v41 = vld [vmem:[%s2612_s3 + $0x10] sm:$0xff]  ;;  %v677_v43 = vld [vmem:[%s2612_s3] sm:$0xff]  ;;  %v1049_v44 = vld [vmem:[%s2614_s5 + $0x18] sm:$0xff]  ;;  %s1490_s13 = sshll.u32 %s270_s8, 8  ;;  %s2569_s28 = scalar_lea.sflag [#allocation3], %s270_s8 }
  0x22   : > { %1768 = vmatprep.subr.mxu1 %v683_v13  ;;  %v1048_v45 = vld [vmem:[%s2614_s5 + $0x10] sm:$0xff]  ;;  %1830 = vmatprep.subr.mxu0 %v1049_v44  ;;  %v2331_v46 = vld [vmem:[%s2611_s2] ss:$0 sm:$0xff]  ;;  %s2493_s16 = scalar_lea.vmem [#allocation2], %s1490_s13 }
  0x23   : > { %1769 = vmatpush3.msra.mxu1 %v683_v13  ;;  %1831 = vmatpush3.msra.mxu0 %v1049_v44  ;;  %s1424_s18 = sshll.u32 %s2493_s16, 4  ;;  %s2562_s18 = int_to_ptr.vmem [resolvable:$true] %s1424_s18 }
  0x24   : > { %1725 = vmatmul.mubr.msk.f32.gmra.mxu0 %vm323_vm0, %v285_v14  ;;  %1746 = vmatmul.mubr.msk.f32.gmra.mxu1 %vm323_vm0, %v299_v16  ;;  %s2063_s22 = scalar_lea.vmem %s2562_s18, 4096  ;;  %p2070_p0 = scmp.lt.s32.totalorder %s2562_s18, %s2068_s29 }
  0x25   : > { %1727 = vmatprep.mubr.msk.f32.mxu0 %vm323_vm0, %v286_v15  ;;  %1748 = vmatprep.mubr.msk.f32.mxu1 %vm323_vm0, %v300_v17  ;;  %p2064_p11 = scmp.ne.s32.totalorder %s2562_s18, %s2063_s22  ;;  %p2071_p1 = scmp.lt.s32.totalorder %s2069_s9, %s2063_s22 }
  0x26   : > { %1770 = vmatprep.subr.mxu1 %v682_v18  ;;  %1832 = vmatprep.subr.mxu0 %v1048_v45 }
  0x27   : > { %1771 = vmatpush3.msra.mxu1 %v682_v18  ;;  %1833 = vmatpush3.msra.mxu0 %v1048_v45  ;;  %p2065_p12 = pnand %p2064_p11, %p2206_p5  ;;  %p2072_p2 = por %p2071_p1, %p2070_p0 }
  0x28   : > { %1728 = vmatmul.mubr.msk.f32.gmra.mxu0 %vm323_vm0, %v287_v19  ;;  %1772 = vmatprep.subr.mxu1 %v681_v20 }
  0x29   : > { %1730 = vmatprep.mubr.msk.f32.mxu0 %vm323_vm0, %v288_v21  ;;  %1749 = vmatmul.mubr.msk.f32.gmra.mxu1 %vm323_vm0, %v301_v22  ;;  %p2066_p13 = pneg %p2065_p12 }
  0x2a   : > { %1751 = vmatprep.mubr.msk.f32.mxu1 %vm323_vm0, %v302_v23  ;;  %1773 = vmatpush3.msra.mxu1 %v681_v20 }
  0x2b   : > { %1774 = vmatprep.subr.mxu1 %v680_v40  ;;  %p2073_p3 = pnand %p2072_p2, %p2066_p13 }
  0x2c   : > { %1731 = vmatmul.mubr.msk.f32.gmra.mxu0 %vm323_vm0, %v289_v24  ;;  %1775 = vmatpush3.msra.mxu1 %v680_v40 }
  0x2d   : > { %1733 = vmatprep.mubr.msk.f32.mxu0 %vm323_vm0, %v290_v25  ;;  %1752 = vmatmul.mubr.msk.f32.gmra.mxu1 %vm323_vm0, %v303_v26 }
  0x2e   : > { %1754 = vmatprep.mubr.msk.f32.mxu1 %vm323_vm0, %v304_v27  ;;  %1776 = vmatprep.subr.mxu1 %v679_v41 }
  0x2f   : > { %1777 = vmatpush3.msra.mxu1 %v679_v41 }
  0x30   : > { %1734 = vmatmul.mubr.msk.f32.gmra.mxu0 %vm323_vm0, %v291_v28  ;;  %1778 = vmatprep.subr.mxu1 %v678_v42 }
  0x31   : > { %1736 = vmatprep.mubr.msk.f32.mxu0 %vm323_vm0, %v292_v29  ;;  %1755 = vmatmul.mubr.msk.f32.gmra.mxu1 %vm323_vm0, %v305_v30 }
  0x32   : > { %1757 = vmatprep.mubr.msk.f32.mxu1 %vm323_vm0, %v306_v31  ;;  %1779 = vmatpush3.msra.mxu1 %v678_v42 }
  0x33   : > { %1780 = vmatprep.subr.mxu1 %v677_v43 }
  0x34   : > { %1737 = vmatmul.mubr.msk.f32.gmra.mxu0 %vm323_vm0, %v293_v32  ;;  %1781 = vmatpush3.msra.mxu1 %v677_v43 }
  0x35   : > { %1739 = vmatprep.mubr.msk.f32.mxu0 %vm323_vm0, %v294_v33  ;;  %1758 = vmatmul.mubr.msk.f32.gmra.mxu1 %vm323_vm0, %v307_v34 }
  0x36   : > { %1760 = vmatprep.mubr.msk.f32.mxu1 %vm323_vm0, %v308_v35 }
  0x38   : > { %1740 = vmatmul.mubr.msk.f32.gmra.mxu0 %vm323_vm0, %v295_v36 }
  0x39   : > { %1761 = vmatmul.mubr.msk.f32.gmra.mxu1 %vm323_vm0, %v309_v37 }
  0x3a   : > { %1763 = vmatprep.mubr.msk.f32.mxu1 %vm323_vm0, %v310_v38 }
  0x3d   : > { %1764 = vmatmul.mubr.msk.f32.gmra.mxu1 %vm323_vm0, %v311_v39 }
  0xdc   : > { %v1720_v47 = vpop.f32.mrf.mxu0 }
  0xdd   : > { %v492_v48 = vadd.f32 %v1720_v47, %v2331_v46 }
  0xde   : > { %v486_v49 = vpop.f32.mrf.mxu0 }
  0xdf   : > { %v487_v50 = vadd.f32 %v2331_v46, %v486_v49  ;;  %v2335_v52 = vpop.f32.mrf.mxu1 }
  0xe0   : > { %v1723_v51 = vpop.f32.mrf.mxu0  ;;  %v572_v36 = vadd.f32 %v2335_v52, %v2331_v46 }
  0xe1   : > { %1935 = vtanh.f32 %v487_v50  ;;  %v502_v53 = vadd.f32 %v1723_v51, %v2331_v46  ;;  %v566_v56 = vpop.f32.mrf.mxu1 }
  0xe2   : > { %1937 = vtanh.f32 %v492_v48  ;;  %v496_v54 = vpop.f32.mrf.mxu0  ;;  %v567_v27 = vadd.f32 %v2331_v46, %v566_v56 }
  0xe3   : > { %v497_v55 = vadd.f32 %v2331_v46, %v496_v54 }
  0xe4   : > { %v1726_v57 = vpop.f32.mrf.mxu0  ;;  %v2339_v58 = vpop.f32.mrf.mxu1 }
  0xe5   : > { %1939 = vtanh.f32 %v497_v55  ;;  %v512_v59 = vadd.f32 %v1726_v57, %v2331_v46  ;;  %v582_v41 = vadd.f32 %v2339_v58, %v2331_v46 }
  0xe6   : > { %1941 = vtanh.f32 %v502_v53  ;;  %v506_v60 = vpop.f32.mrf.mxu0  ;;  %v576_v62 = vpop.f32.mrf.mxu1 }
  0xe7   : > { %v507_v61 = vadd.f32 %v2331_v46, %v506_v60  ;;  %v577_v34 = vadd.f32 %v2331_v46, %v576_v62 }
  0xe8   : > { %v1729_v63 = vpop.f32.mrf.mxu0 }
  0xe9   : > { %1943 = vtanh.f32 %v507_v61  ;;  %v2343_v0 = vpop.f32.mrf.mxu1  ;;  %v522_v1 = vadd.f32 %v1729_v63, %v2331_v46 }
  0xea   : > { %1945 = vtanh.f32 %v512_v59  ;;  %v516_v2 = vpop.f32.mrf.mxu0  ;;  %v592_v47 = vadd.f32 %v2343_v0, %v2331_v46 }
  0xeb   : > { %v517_v3 = vadd.f32 %v2331_v46, %v516_v2  ;;  %v586_v4 = vpop.f32.mrf.mxu1 }
  0xec   : > { %v1732_v5 = vpop.f32.mrf.mxu0  ;;  %v587_v39 = vadd.f32 %v2331_v46, %v586_v4 }
  0xed   : > { %1947 = vtanh.f32 %v517_v3  ;;  %v532_v7 = vadd.f32 %v1732_v5, %v2331_v46  ;;  %v2348_v9 = vpop.f32.mrf.mxu1 }
  0xee   : > { %v1936_v6 = vpop.eup %1935  ;;  %1949 = vtanh.f32 %v522_v1  ;;  %v526_v8 = vpop.f32.mrf.mxu0  ;;  %v602_v53 = vadd.f32 %v2348_v9, %v2331_v46 }
  0xef   : > { %v1938_v10 = vpop.eup %1937  ;;  %v527_v11 = vadd.f32 %v2331_v46, %v526_v8  ;;  %1782 = vmatprep.mubr.msk.f32.mxu1 %vm692_vm1, %v1936_v6  ;;  %v596_v16 = vpop.f32.mrf.mxu1 }
  0xf0   : > { %v1735_v12 = vpop.f32.mrf.mxu0  ;;  %1783 = vmatmul.mubr.msk.f32.vlgmr.msra.gmra.mxu1 %vm692_vm1, %v1938_v10  ;;  %v597_v44 = vadd.f32 %v2331_v46, %v596_v16  ;;  %v1046_v16 = vld [vmem:[%s2614_s5] sm:$0xff] }
  0xf1   : > { %1951 = vtanh.f32 %v527_v11  ;;  %v542_v14 = vadd.f32 %v1735_v12, %v2331_v46  ;;  %v1756_v23 = vpop.f32.mrf.mxu1 }
  0xf2   : > { %v1940_v13 = vpop.eup %1939  ;;  %1953 = vtanh.f32 %v532_v7  ;;  %v536_v15 = vpop.f32.mrf.mxu0  ;;  %v612_v58 = vadd.f32 %v1756_v23, %v2331_v46 }
  0xf3   : > { %v1942_v17 = vpop.eup %1941  ;;  %v537_v18 = vadd.f32 %v2331_v46, %v536_v15  ;;  %1785 = vmatprep.mubr.msk.f32.mxu1 %vm692_vm1, %v1940_v13  ;;  %v606_v31 = vpop.f32.mrf.mxu1  ;;  %v1047_v15 = vld [vmem:[%s2614_s5 + $0x8] sm:$0xff] }
  0xf4   : > { %v1738_v19 = vpop.f32.mrf.mxu0  ;;  %1786 = vmatmul.mubr.msk.f32.gmra.mxu1 %vm692_vm1, %v1942_v17  ;;  %v607_v51 = vadd.f32 %v2331_v46, %v606_v31  ;;  %1834 = vmatprep.subr.mxu0 %v1047_v15  ;;  %v2418_v17 = vld [vmem:[%s2613_s4] ss:$0 sm:$0xff] }
  0xf5   : > { %1955 = vtanh.f32 %v537_v18  ;;  %v552_v21 = vadd.f32 %v1738_v19, %v2331_v46  ;;  %v1759_v37 = vpop.f32.mrf.mxu1  ;;  %1835 = vmatpush3.msra.mxu0 %v1047_v15 }
  0xf6   : > { %v1944_v20 = vpop.eup %1943  ;;  %1957 = vtanh.f32 %v542_v14  ;;  %v546_v22 = vpop.f32.mrf.mxu0  ;;  %v622_v63 = vadd.f32 %v1759_v37, %v2331_v46  ;;  %1836 = vmatprep.subr.mxu0 %v1046_v16 }
  0xf7   : > { %v1946_v24 = vpop.eup %1945  ;;  %v547_v25 = vadd.f32 %v2331_v46, %v546_v22  ;;  %1788 = vmatprep.mubr.msk.f32.mxu1 %vm692_vm1, %v1944_v20  ;;  %v616_v42 = vpop.f32.mrf.mxu1  ;;  %1837 = vmatpush3.msra.mxu0 %v1046_v16 }
  0xf8   : > { %v1741_v26 = vpop.f32.mrf.mxu0  ;;  %1789 = vmatmul.mubr.msk.f32.gmra.mxu1 %vm692_vm1, %v1946_v24  ;;  %v617_v56 = vadd.f32 %v2331_v46, %v616_v42 }
  0xf9   : > { %1959 = vtanh.f32 %v547_v25  ;;  %v562_v29 = vadd.f32 %v1741_v26, %v2331_v46  ;;  %v1762_v48 = vpop.f32.mrf.mxu1 }
  0xfa   : > { %v1948_v28 = vpop.eup %1947  ;;  %1961 = vtanh.f32 %v552_v21  ;;  %v556_v30 = vpop.f32.mrf.mxu0  ;;  %v632_v4 = vadd.f32 %v1762_v48, %v2331_v46 }
  0xfb   : > { %v1950_v32 = vpop.eup %1949  ;;  %v557_v33 = vadd.f32 %v2331_v46, %v556_v30  ;;  %1791 = vmatprep.mubr.msk.f32.mxu1 %vm692_vm1, %v1948_v28  ;;  %1963 = vtanh.f32 %v567_v27  ;;  %v626_v54 = vpop.f32.mrf.mxu1 }
  0xfc   : > { %1792 = vmatmul.mubr.msk.f32.gmra.mxu1 %vm692_vm1, %v1950_v32  ;;  %v627_v61 = vadd.f32 %v2331_v46, %v626_v54 }
  0xfd   : > { %1965 = vtanh.f32 %v557_v33  ;;  %v1765_v59 = vpop.f32.mrf.mxu1 }
  0xfe   : > { %v1952_v35 = vpop.eup %1951  ;;  %1967 = vtanh.f32 %v562_v29  ;;  %v642_v7 = vadd.f32 %v1765_v59, %v2331_v46 }
  0xff   : > { %v1954_v38 = vpop.eup %1953  ;;  %1794 = vmatprep.mubr.msk.f32.mxu1 %vm692_vm1, %v1952_v35  ;;  %1969 = vtanh.f32 %v577_v34  ;;  %v636_v0 = vpop.f32.mrf.mxu1 }
 0x100   : > { %1795 = vmatmul.mubr.msk.f32.gmra.mxu1 %vm692_vm1, %v1954_v38  ;;  %1971 = vtanh.f32 %v572_v36  ;;  %v637_v2 = vadd.f32 %v2331_v46, %v636_v0 }
 0x101   : > { %1973 = vtanh.f32 %v587_v39 }
 0x102   : > { %v1956_v40 = vpop.eup %1955  ;;  %1975 = vtanh.f32 %v582_v41 }
 0x103   : > { %v1958_v43 = vpop.eup %1957  ;;  %1797 = vmatprep.mubr.msk.f32.mxu1 %vm692_vm1, %v1956_v40  ;;  %1977 = vtanh.f32 %v597_v44 }
 0x104   : > { %1798 = vmatmul.mubr.msk.f32.gmra.mxu1 %vm692_vm1, %v1958_v43  ;;  %1979 = vtanh.f32 %v592_v47 }
 0x105   : > { %1981 = vtanh.f32 %v607_v51 }
 0x106   : > { %v1960_v45 = vpop.eup %1959  ;;  %1983 = vtanh.f32 %v602_v53 }
 0x107   : > { %v1962_v49 = vpop.eup %1961  ;;  %1800 = vmatprep.mubr.msk.f32.mxu1 %vm692_vm1, %v1960_v45  ;;  %1985 = vtanh.f32 %v617_v56 }
 0x108   : > { %1801 = vmatmul.mubr.msk.f32.gmra.mxu1 %vm692_vm1, %v1962_v49  ;;  %v1964_v50 = vpop.eup %1963  ;;  %1987 = vtanh.f32 %v612_v58 }
 0x109   : > { %1989 = vtanh.f32 %v627_v61 }
 0x10a   : > { %v1966_v52 = vpop.eup %1965  ;;  %1991 = vtanh.f32 %v622_v63 }
 0x10b   : > { %v1968_v55 = vpop.eup %1967  ;;  %1803 = vmatprep.mubr.msk.f32.mxu1 %vm692_vm1, %v1966_v52  ;;  %1993 = vtanh.f32 %v637_v2 }
 0x10c   : > { %1804 = vmatmul.mubr.msk.f32.gmra.mxu1 %vm692_vm1, %v1968_v55  ;;  %v1970_v57 = vpop.eup %1969  ;;  %1995 = vtanh.f32 %v632_v4 }
 0x10d   : > { %1806 = vmatprep.mubr.msk.f32.mxu1 %vm692_vm1, %v1964_v50  ;;  %v1972_v60 = vpop.eup %1971  ;;  %1997 = vtanh.f32 %v642_v7 }
 0x10e   : > { %v1974_v62 = vpop.eup %1973 }
 0x10f   : > { %v1976_v1 = vpop.eup %1975 }
 0x110   : > { %1807 = vmatmul.mubr.msk.f32.gmra.mxu1 %vm692_vm1, %v1972_v60  ;;  %v1978_v3 = vpop.eup %1977 }
 0x111   : > { %1809 = vmatprep.mubr.msk.f32.mxu1 %vm692_vm1, %v1970_v57  ;;  %v1980_v5 = vpop.eup %1979 }
 0x112   : > { %v1982_v6 = vpop.eup %1981 }
 0x113   : > { %v1984_v8 = vpop.eup %1983 }
 0x114   : > { %1810 = vmatmul.mubr.msk.f32.gmra.mxu1 %vm692_vm1, %v1976_v1  ;;  %v1986_v9 = vpop.eup %1985 }
 0x115   : > { %1812 = vmatprep.mubr.msk.f32.mxu1 %vm692_vm1, %v1974_v62  ;;  %v1988_v10 = vpop.eup %1987 }
 0x116   : > { %v1990_v11 = vpop.eup %1989 }
 0x117   : > { %v1992_v12 = vpop.eup %1991 }
 0x118   : > { %1813 = vmatmul.mubr.msk.f32.gmra.mxu1 %vm692_vm1, %v1980_v5  ;;  %v1994_v13 = vpop.eup %1993 }
 0x119   : > { %1815 = vmatprep.mubr.msk.f32.mxu1 %vm692_vm1, %v1978_v3  ;;  %v1996_v46 = vpop.eup %1995 }
 0x11a   : > { %v1998_v14 = vpop.eup %1997 }
 0x11c   : > { %1816 = vmatmul.mubr.msk.f32.gmra.mxu1 %vm692_vm1, %v1984_v8 }
 0x11d   : > { %1818 = vmatprep.mubr.msk.f32.mxu1 %vm692_vm1, %v1982_v6 }
 0x120   : > { %1819 = vmatmul.mubr.msk.f32.gmra.mxu1 %vm692_vm1, %v1988_v10 }
 0x121   : > { %1821 = vmatprep.mubr.msk.f32.mxu1 %vm692_vm1, %v1986_v9 }
 0x124   : > { %1822 = vmatmul.mubr.msk.f32.gmra.mxu1 %vm692_vm1, %v1992_v12 }
 0x125   : > { %1824 = vmatprep.mubr.msk.f32.mxu1 %vm692_vm1, %v1990_v11 }
 0x128   : > { %1825 = vmatmul.mubr.msk.f32.gmra.mxu1 %vm692_vm1, %v1996_v46 }
 0x129   : > { %1827 = vmatprep.mubr.msk.f32.mxu1 %vm692_vm1, %v1994_v13 }
 0x12c   : > { %1828 = vmatmul.mubr.msk.f32.gmra.mxu1 %vm692_vm1, %v1998_v14 }
 0x1b0   : > { %v1784_v18 = vpop.f32.mrf.mxu1 }
 0x1b1   : > { %v861_v19 = vadd.f32 %v1784_v18, %v2418_v17 }
 0x1b2   : > { %v855_v20 = vpop.f32.mrf.mxu1 }
 0x1b3   : > { %v856_v21 = vadd.f32 %v2418_v17, %v855_v20 }
 0x1b4   : > { %v1787_v22 = vpop.f32.mrf.mxu1 }
 0x1b5   : > { %1999 = vtanh.f32 %v856_v21  ;;  %v871_v23 = vadd.f32 %v1787_v22, %v2418_v17 }
 0x1b6   : > { %2001 = vtanh.f32 %v861_v19  ;;  %v865_v24 = vpop.f32.mrf.mxu1 }
 0x1b7   : > { %v866_v25 = vadd.f32 %v2418_v17, %v865_v24 }
 0x1b8   : > { %v1790_v26 = vpop.f32.mrf.mxu1 }
 0x1b9   : > { %2003 = vtanh.f32 %v866_v25  ;;  %v881_v27 = vadd.f32 %v1790_v26, %v2418_v17 }
 0x1ba   : > { %2005 = vtanh.f32 %v871_v23  ;;  %v875_v28 = vpop.f32.mrf.mxu1 }
 0x1bb   : > { %v876_v29 = vadd.f32 %v2418_v17, %v875_v28 }
 0x1bc   : > { %v1793_v30 = vpop.f32.mrf.mxu1 }
 0x1bd   : > { %2007 = vtanh.f32 %v876_v29  ;;  %v891_v31 = vadd.f32 %v1793_v30, %v2418_v17 }
 0x1be   : > { %2009 = vtanh.f32 %v881_v27  ;;  %v885_v32 = vpop.f32.mrf.mxu1 }
 0x1bf   : > { %v886_v33 = vadd.f32 %v2418_v17, %v885_v32 }
 0x1c0   : > { %v1796_v34 = vpop.f32.mrf.mxu1 }
 0x1c1   : > { %2011 = vtanh.f32 %v886_v33  ;;  %v901_v36 = vadd.f32 %v1796_v34, %v2418_v17 }
 0x1c2   : > { %v2000_v35 = vpop.eup %1999  ;;  %2013 = vtanh.f32 %v891_v31  ;;  %v895_v37 = vpop.f32.mrf.mxu1 }
 0x1c3   : > { %v2002_v38 = vpop.eup %2001  ;;  %v896_v39 = vadd.f32 %v2418_v17, %v895_v37  ;;  %1838 = vmatprep.mubr.msk.f32.mxu0 %vm323_vm0, %v2000_v35 }
 0x1c4   : > { %v1799_v40 = vpop.f32.mrf.mxu1  ;;  %1839 = vmatmul.mubr.msk.f32.vlgmr.msra.gmra.mxu0 %vm323_vm0, %v2002_v38 }
 0x1c5   : > { %2015 = vtanh.f32 %v896_v39  ;;  %v911_v42 = vadd.f32 %v1799_v40, %v2418_v17 }
 0x1c6   : > { %v2004_v41 = vpop.eup %2003  ;;  %2017 = vtanh.f32 %v901_v36  ;;  %v905_v43 = vpop.f32.mrf.mxu1 }
 0x1c7   : > { %v2006_v44 = vpop.eup %2005  ;;  %v906_v45 = vadd.f32 %v2418_v17, %v905_v43  ;;  %1841 = vmatprep.mubr.msk.f32.mxu0 %vm323_vm0, %v2004_v41 }
 0x1c8   : > { %v1802_v47 = vpop.f32.mrf.mxu1  ;;  %1842 = vmatmul.mubr.msk.f32.gmra.mxu0 %vm323_vm0, %v2006_v44 }
 0x1c9   : > { %2019 = vtanh.f32 %v906_v45  ;;  %v921_v49 = vadd.f32 %v1802_v47, %v2418_v17 }
 0x1ca   : > { %v2008_v48 = vpop.eup %2007  ;;  %2021 = vtanh.f32 %v911_v42  ;;  %v915_v50 = vpop.f32.mrf.mxu1 }
 0x1cb   : > { %v2010_v51 = vpop.eup %2009  ;;  %v916_v52 = vadd.f32 %v2418_v17, %v915_v50  ;;  %1844 = vmatprep.mubr.msk.f32.mxu0 %vm323_vm0, %v2008_v48 }
 0x1cc   : > { %v1805_v53 = vpop.f32.mrf.mxu1  ;;  %1845 = vmatmul.mubr.msk.f32.gmra.mxu0 %vm323_vm0, %v2010_v51  ;;  %v2490_v51 = vld [vmem:[%s2615_s6] ss:$0 sm:$0xff] }
 0x1cd   : > { %2023 = vtanh.f32 %v916_v52  ;;  %v931_v55 = vadd.f32 %v1805_v53, %v2418_v17 }
 0x1ce   : > { %v2012_v54 = vpop.eup %2011  ;;  %2025 = vtanh.f32 %v921_v49  ;;  %v925_v56 = vpop.f32.mrf.mxu1 }
 0x1cf   : > { %v2014_v57 = vpop.eup %2013  ;;  %v926_v58 = vadd.f32 %v2418_v17, %v925_v56  ;;  %1847 = vmatprep.mubr.msk.f32.mxu0 %vm323_vm0, %v2012_v54 }
 0x1d0   : > { %v1808_v59 = vpop.f32.mrf.mxu1  ;;  %1848 = vmatmul.mubr.msk.f32.gmra.mxu0 %vm323_vm0, %v2014_v57 }
 0x1d1   : > { %2027 = vtanh.f32 %v926_v58  ;;  %v941_v61 = vadd.f32 %v1808_v59, %v2418_v17 }
 0x1d2   : > { %v2016_v60 = vpop.eup %2015  ;;  %2029 = vtanh.f32 %v931_v55  ;;  %v935_v62 = vpop.f32.mrf.mxu1 }
 0x1d3   : > { %v2018_v63 = vpop.eup %2017  ;;  %v936_v0 = vadd.f32 %v2418_v17, %v935_v62  ;;  %1850 = vmatprep.mubr.msk.f32.mxu0 %vm323_vm0, %v2016_v60 }
 0x1d4   : > { %v1811_v1 = vpop.f32.mrf.mxu1  ;;  %1851 = vmatmul.mubr.msk.f32.gmra.mxu0 %vm323_vm0, %v2018_v63 }
 0x1d5   : > { %2031 = vtanh.f32 %v936_v0  ;;  %v951_v3 = vadd.f32 %v1811_v1, %v2418_v17 }
 0x1d6   : > { %v2020_v2 = vpop.eup %2019  ;;  %2033 = vtanh.f32 %v941_v61  ;;  %v945_v4 = vpop.f32.mrf.mxu1 }
 0x1d7   : > { %v2022_v5 = vpop.eup %2021  ;;  %v946_v6 = vadd.f32 %v2418_v17, %v945_v4  ;;  %1853 = vmatprep.mubr.msk.f32.mxu0 %vm323_vm0, %v2020_v2 }
 0x1d8   : > { %v1814_v7 = vpop.f32.mrf.mxu1  ;;  %1854 = vmatmul.mubr.msk.f32.gmra.mxu0 %vm323_vm0, %v2022_v5 }
 0x1d9   : > { %2035 = vtanh.f32 %v946_v6  ;;  %v961_v9 = vadd.f32 %v1814_v7, %v2418_v17 }
 0x1da   : > { %v2024_v8 = vpop.eup %2023  ;;  %2037 = vtanh.f32 %v951_v3  ;;  %v955_v10 = vpop.f32.mrf.mxu1 }
 0x1db   : > { %v2026_v11 = vpop.eup %2025  ;;  %v956_v12 = vadd.f32 %v2418_v17, %v955_v10  ;;  %1856 = vmatprep.mubr.msk.f32.mxu0 %vm323_vm0, %v2024_v8 }
 0x1dc   : > { %v1817_v13 = vpop.f32.mrf.mxu1  ;;  %1857 = vmatmul.mubr.msk.f32.gmra.mxu0 %vm323_vm0, %v2026_v11 }
 0x1dd   : > { %2039 = vtanh.f32 %v956_v12  ;;  %v971_v14 = vadd.f32 %v1817_v13, %v2418_v17 }
 0x1de   : > { %v2028_v46 = vpop.eup %2027  ;;  %2041 = vtanh.f32 %v961_v9  ;;  %v965_v15 = vpop.f32.mrf.mxu1 }
 0x1df   : > { %v2030_v16 = vpop.eup %2029  ;;  %v966_v18 = vadd.f32 %v2418_v17, %v965_v15  ;;  %1859 = vmatprep.mubr.msk.f32.mxu0 %vm323_vm0, %v2028_v46 }
 0x1e0   : > { %v1820_v19 = vpop.f32.mrf.mxu1  ;;  %1860 = vmatmul.mubr.msk.f32.gmra.mxu0 %vm323_vm0, %v2030_v16 }
 0x1e1   : > { %2043 = vtanh.f32 %v966_v18  ;;  %v981_v21 = vadd.f32 %v1820_v19, %v2418_v17 }
 0x1e2   : > { %v2032_v20 = vpop.eup %2031  ;;  %2045 = vtanh.f32 %v971_v14  ;;  %v975_v22 = vpop.f32.mrf.mxu1 }
 0x1e3   : > { %v2034_v23 = vpop.eup %2033  ;;  %v976_v24 = vadd.f32 %v2418_v17, %v975_v22  ;;  %1862 = vmatprep.mubr.msk.f32.mxu0 %vm323_vm0, %v2032_v20 }
 0x1e4   : > { %v1823_v25 = vpop.f32.mrf.mxu1  ;;  %1863 = vmatmul.mubr.msk.f32.gmra.mxu0 %vm323_vm0, %v2034_v23 }
 0x1e5   : > { %2047 = vtanh.f32 %v976_v24  ;;  %v991_v27 = vadd.f32 %v1823_v25, %v2418_v17 }
 0x1e6   : > { %v2036_v26 = vpop.eup %2035  ;;  %2049 = vtanh.f32 %v981_v21  ;;  %v985_v28 = vpop.f32.mrf.mxu1 }
 0x1e7   : > { %v2038_v29 = vpop.eup %2037  ;;  %v986_v30 = vadd.f32 %v2418_v17, %v985_v28  ;;  %1865 = vmatprep.mubr.msk.f32.mxu0 %vm323_vm0, %v2036_v26 }
 0x1e8   : > { %v1826_v31 = vpop.f32.mrf.mxu1  ;;  %1866 = vmatmul.mubr.msk.f32.gmra.mxu0 %vm323_vm0, %v2038_v29 }
 0x1e9   : > { %2051 = vtanh.f32 %v986_v30  ;;  %v1001_v33 = vadd.f32 %v1826_v31, %v2418_v17 }
 0x1ea   : > { %v2040_v32 = vpop.eup %2039  ;;  %2053 = vtanh.f32 %v991_v27  ;;  %v995_v34 = vpop.f32.mrf.mxu1 }
 0x1eb   : > { %v2042_v35 = vpop.eup %2041  ;;  %v996_v36 = vadd.f32 %v2418_v17, %v995_v34  ;;  %1868 = vmatprep.mubr.msk.f32.mxu0 %vm323_vm0, %v2040_v32 }
 0x1ec   : > { %v1829_v37 = vpop.f32.mrf.mxu1  ;;  %1869 = vmatmul.mubr.msk.f32.gmra.mxu0 %vm323_vm0, %v2042_v35 }
 0x1ed   : > { %2055 = vtanh.f32 %v996_v36  ;;  %v1011_v39 = vadd.f32 %v1829_v37, %v2418_v17 }
 0x1ee   : > { %v2044_v38 = vpop.eup %2043  ;;  %2057 = vtanh.f32 %v1001_v33  ;;  %v1005_v40 = vpop.f32.mrf.mxu1 }
 0x1ef   : > { %v2046_v41 = vpop.eup %2045  ;;  %v1006_v42 = vadd.f32 %v2418_v17, %v1005_v40  ;;  %1871 = vmatprep.mubr.msk.f32.mxu0 %vm323_vm0, %v2044_v38 }
 0x1f0   : > { %1872 = vmatmul.mubr.msk.f32.gmra.mxu0 %vm323_vm0, %v2046_v41 }
 0x1f1   : > { %2059 = vtanh.f32 %v1006_v42 }
 0x1f2   : > { %v2048_v43 = vpop.eup %2047  ;;  %2061 = vtanh.f32 %v1011_v39 }
 0x1f3   : > { %v2050_v44 = vpop.eup %2049  ;;  %1874 = vmatprep.mubr.msk.f32.mxu0 %vm323_vm0, %v2048_v43 }
 0x1f4   : > { %1875 = vmatmul.mubr.msk.f32.gmra.mxu0 %vm323_vm0, %v2050_v44 }
 0x1f6   : > { %v2052_v45 = vpop.eup %2051 }
 0x1f7   : > { %v2054_v47 = vpop.eup %2053  ;;  %1877 = vmatprep.mubr.msk.f32.mxu0 %vm323_vm0, %v2052_v45 }
 0x1f8   : > { %1878 = vmatmul.mubr.msk.f32.gmra.mxu0 %vm323_vm0, %v2054_v47 }
 0x1fa   : > { %v2056_v17 = vpop.eup %2055 }
 0x1fb   : > { %v2058_v48 = vpop.eup %2057  ;;  %1880 = vmatprep.mubr.msk.f32.mxu0 %vm323_vm0, %v2056_v17 }
 0x1fc   : > { %1881 = vmatmul.mubr.msk.f32.gmra.mxu0 %vm323_vm0, %v2058_v48 }
 0x1fe   : > { %v2060_v49 = vpop.eup %2059 }
 0x1ff   : > { %v2062_v50 = vpop.eup %2061  ;;  %1883 = vmatprep.mubr.msk.f32.mxu0 %vm323_vm0, %v2060_v49 }
 0x200   : > { %1884 = vmatmul.mubr.msk.f32.gmra.mxu0 %vm323_vm0, %v2062_v50 }
 0x284   : > { %v1840_v52 = vpop.f32.mrf.mxu0 }
 0x285   : > { %v1225_v53 = vadd.f32 %v1840_v52, %v2490_v51 }
 0x286   : > { %v1219_v54 = vpop.f32.mrf.mxu0 }
 0x287   : > { %1379 = vst [vmem:[%s2493_s16 + $0x8] sm:$0xff] %v1225_v53  ;;  %v1220_v55 = vadd.f32 %v2490_v51, %v1219_v54 }
 0x288   : > { %v1843_v56 = vpop.f32.mrf.mxu0 }
 0x289   : > { %1378 = vst [vmem:[%s2493_s16] sm:$0xff] %v1220_v55  ;;  %v1235_v57 = vadd.f32 %v1843_v56, %v2490_v51 }
 0x28a   : > { %v1229_v58 = vpop.f32.mrf.mxu0 }
 0x28b   : > { %1381 = vst [vmem:[%s2493_s16 + $0x18] sm:$0xff] %v1235_v57  ;;  %v1230_v59 = vadd.f32 %v2490_v51, %v1229_v58 }
 0x28c   : > { %v1846_v60 = vpop.f32.mrf.mxu0 }
 0x28d   : > { %1380 = vst [vmem:[%s2493_s16 + $0x10] sm:$0xff] %v1230_v59  ;;  %v1245_v61 = vadd.f32 %v1846_v60, %v2490_v51 }
 0x28e   : > { %v1239_v62 = vpop.f32.mrf.mxu0 }
 0x28f   : > { %1383 = vst [vmem:[%s2493_s16 + $0x28] sm:$0xff] %v1245_v61  ;;  %v1240_v63 = vadd.f32 %v2490_v51, %v1239_v62 }
 0x290   : > { %v1849_v0 = vpop.f32.mrf.mxu0 }
 0x291   : > { %1382 = vst [vmem:[%s2493_s16 + $0x20] sm:$0xff] %v1240_v63  ;;  %v1255_v1 = vadd.f32 %v1849_v0, %v2490_v51 }
 0x292   : > { %v1249_v2 = vpop.f32.mrf.mxu0 }
 0x293   : > { %1385 = vst [vmem:[%s2493_s16 + $0x38] sm:$0xff] %v1255_v1  ;;  %v1250_v3 = vadd.f32 %v2490_v51, %v1249_v2 }
 0x294   : > { %v1852_v4 = vpop.f32.mrf.mxu0 }
 0x295   : > { %1384 = vst [vmem:[%s2493_s16 + $0x30] sm:$0xff] %v1250_v3  ;;  %v1265_v5 = vadd.f32 %v1852_v4, %v2490_v51 }
 0x296   : > { %v1259_v6 = vpop.f32.mrf.mxu0 }
 0x297   : > { %1387 = vst [vmem:[%s2493_s16 + $0x48] sm:$0xff] %v1265_v5  ;;  %v1260_v7 = vadd.f32 %v2490_v51, %v1259_v6 }
 0x298   : > { %v1855_v8 = vpop.f32.mrf.mxu0 }
 0x299   : > { %1386 = vst [vmem:[%s2493_s16 + $0x40] sm:$0xff] %v1260_v7  ;;  %v1275_v9 = vadd.f32 %v1855_v8, %v2490_v51 }
 0x29a   : > { %v1269_v10 = vpop.f32.mrf.mxu0 }
 0x29b   : > { %1389 = vst [vmem:[%s2493_s16 + $0x58] sm:$0xff] %v1275_v9  ;;  %v1270_v11 = vadd.f32 %v2490_v51, %v1269_v10 }
 0x29c   : > { %v1858_v12 = vpop.f32.mrf.mxu0 }
 0x29d   : > { %1388 = vst [vmem:[%s2493_s16 + $0x50] sm:$0xff] %v1270_v11  ;;  %v1285_v13 = vadd.f32 %v1858_v12, %v2490_v51 }
 0x29e   : > { %v1279_v46 = vpop.f32.mrf.mxu0 }
 0x29f   : > { %1391 = vst [vmem:[%s2493_s16 + $0x68] sm:$0xff] %v1285_v13  ;;  %v1280_v14 = vadd.f32 %v2490_v51, %v1279_v46 }
 0x2a0   : > { %v1861_v15 = vpop.f32.mrf.mxu0 }
 0x2a1   : > { %1390 = vst [vmem:[%s2493_s16 + $0x60] sm:$0xff] %v1280_v14  ;;  %v1295_v16 = vadd.f32 %v1861_v15, %v2490_v51 }
 0x2a2   : > { %v1289_v18 = vpop.f32.mrf.mxu0 }
 0x2a3   : > { %1393 = vst [vmem:[%s2493_s16 + $0x78] sm:$0xff] %v1295_v16  ;;  %v1290_v19 = vadd.f32 %v2490_v51, %v1289_v18 }
 0x2a4   : > { %v1864_v20 = vpop.f32.mrf.mxu0 }
 0x2a5   : > { %1392 = vst [vmem:[%s2493_s16 + $0x70] sm:$0xff] %v1290_v19  ;;  %v1305_v21 = vadd.f32 %v1864_v20, %v2490_v51 }
 0x2a6   : > { %v1299_v22 = vpop.f32.mrf.mxu0 }
 0x2a7   : > { %1395 = vst [vmem:[%s2493_s16 + $0x88] sm:$0xff] %v1305_v21  ;;  %v1300_v23 = vadd.f32 %v2490_v51, %v1299_v22 }
 0x2a8   : > { %v1867_v24 = vpop.f32.mrf.mxu0 }
 0x2a9   : > { %1394 = vst [vmem:[%s2493_s16 + $0x80] sm:$0xff] %v1300_v23  ;;  %v1315_v25 = vadd.f32 %v1867_v24, %v2490_v51 }
 0x2aa   : > { %v1309_v26 = vpop.f32.mrf.mxu0 }
 0x2ab   : > { %1397 = vst [vmem:[%s2493_s16 + $0x98] sm:$0xff] %v1315_v25  ;;  %v1310_v27 = vadd.f32 %v2490_v51, %v1309_v26 }
 0x2ac   : > { %v1870_v28 = vpop.f32.mrf.mxu0 }
 0x2ad   : > { %1396 = vst [vmem:[%s2493_s16 + $0x90] sm:$0xff] %v1310_v27  ;;  %v1325_v29 = vadd.f32 %v1870_v28, %v2490_v51 }
 0x2ae   : > { %v1319_v30 = vpop.f32.mrf.mxu0 }
 0x2af   : > { %1399 = vst [vmem:[%s2493_s16 + $0xa8] sm:$0xff] %v1325_v29  ;;  %v1320_v31 = vadd.f32 %v2490_v51, %v1319_v30 }
 0x2b0   : > { %v1873_v32 = vpop.f32.mrf.mxu0 }
 0x2b1   : > { %1398 = vst [vmem:[%s2493_s16 + $0xa0] sm:$0xff] %v1320_v31  ;;  %v1335_v33 = vadd.f32 %v1873_v32, %v2490_v51 }
 0x2b2   : > { %v1329_v34 = vpop.f32.mrf.mxu0 }
 0x2b3   : > { %1401 = vst [vmem:[%s2493_s16 + $0xb8] sm:$0xff] %v1335_v33  ;;  %v1330_v35 = vadd.f32 %v2490_v51, %v1329_v34 }
 0x2b4   : > { %v1876_v36 = vpop.f32.mrf.mxu0 }
 0x2b5   : > { %1400 = vst [vmem:[%s2493_s16 + $0xb0] sm:$0xff] %v1330_v35  ;;  %v1345_v37 = vadd.f32 %v1876_v36, %v2490_v51 }
 0x2b6   : > { %v1339_v38 = vpop.f32.mrf.mxu0 }
 0x2b7   : > { %1403 = vst [vmem:[%s2493_s16 + $0xc8] sm:$0xff] %v1345_v37  ;;  %v1340_v39 = vadd.f32 %v2490_v51, %v1339_v38 }
 0x2b8   : > { %v1879_v40 = vpop.f32.mrf.mxu0 }
 0x2b9   : > { %1402 = vst [vmem:[%s2493_s16 + $0xc0] sm:$0xff] %v1340_v39  ;;  %v1355_v41 = vadd.f32 %v1879_v40, %v2490_v51 }
 0x2ba   : > { %v1349_v42 = vpop.f32.mrf.mxu0 }
 0x2bb   : > { %1405 = vst [vmem:[%s2493_s16 + $0xd8] sm:$0xff] %v1355_v41  ;;  %v1350_v43 = vadd.f32 %v2490_v51, %v1349_v42 }
 0x2bc   : > { %v1882_v44 = vpop.f32.mrf.mxu0 }
 0x2bd   : > { %1404 = vst [vmem:[%s2493_s16 + $0xd0] sm:$0xff] %v1350_v43  ;;  %v1365_v45 = vadd.f32 %v1882_v44, %v2490_v51 }
 0x2be   : > { %v1359_v47 = vpop.f32.mrf.mxu0 }
 0x2bf   : > { %1407 = vst [vmem:[%s2493_s16 + $0xe8] sm:$0xff] %v1365_v45  ;;  %v1360_v17 = vadd.f32 %v2490_v51, %v1359_v47 }
 0x2c0   : > { %v1885_v48 = vpop.f32.mrf.mxu0 }
 0x2c1   : > { %1406 = vst [vmem:[%s2493_s16 + $0xe0] sm:$0xff] %v1360_v17  ;;  %v1375_v49 = vadd.f32 %v1885_v48, %v2490_v51 }
 0x2c2   : > { %v1369_v50 = vpop.f32.mrf.mxu0 }
 0x2c3   : > { %1409 = vst [vmem:[%s2493_s16 + $0xf8] sm:$0xff] %v1375_v49  ;;  %v1370_v52 = vadd.f32 %v2490_v51, %v1369_v50 }
 0x2c5   : > { %1408 = vst [vmem:[%s2493_s16 + $0xf0] sm:$0xff] %v1370_v52 }
 0x2c6   : > { %2076 = shalt.err (!%p2073_p3)
}
 0x2c7   : > { %s2077_s8 = scalar_lea.hbm %s2560_s21, 4096  ;;  %s2081_s15 = scalar_lea.hbm %s2616_s7, 16384 }
 0x2c8   : > { %p2078_p4 = scmp.ne.s32.totalorder %s2560_s21, %s2077_s8  ;;  %p2082_p9 = scmp.lt.s32.totalorder %s2560_s21, %s2616_s7 }
 0x2c9   : > { %p2083_p10 = scmp.lt.s32.totalorder %s2081_s15, %s2077_s8 }
 0x2ca   : > { %p2079_p7 = pnand %p2078_p4, %p2206_p5 }
 0x2cb   : > { %p2084_p11 = por %p2083_p10, %p2082_p9 }
 0x2cc   : > { %p2080_p8 = pneg %p2079_p7 }
 0x2ce   : > { %p2085_p12 = pnand %p2084_p11, %p2080_p8 }
 0x2d0   : > { %2088 = shalt.err (!%p2085_p12)
}
 0x2d1   : > { %s2126_s19 = smov 128   ;;  %s2127_s20 = smov 8  }
 0x2d2   : > { %1894 = dma.vmem_to_hbm [thread:$0]  (%p2206_p5), %s2562_s18, 4096, %s2560_s21, %s2569_s28, %s2126_s19, %s2126_s19, %s2127_s20  }
 0x2d3 PF: > { %p1900_p13 = scmp.ge.s32.totalorder %s2123_s27, 2  ;;  %s1439_s22 = sand.u32 1, %s2111_s24  }
 0x2d4   : > { %s1440_s23 = scalar_lea.sflag [#allocation3], %s1439_s22 }
 0x2d5   : > { %p1897_p0 = pnand %p1900_p13, %p2210_p6 }
 0x2d7   : > { %p1898_p1 = pneg %p1897_p0 }
 0x2d9   : > { %2106 = dma.done.wait (%p1898_p1), %s1440_s23, 4096  }
 0x2da   : > { %2108 = vsyncadd (%p1898_p1), %s1440_s23, 4294963200  ;;  %p17_p2 = scmp.ge.s32.totalorder %s2193_s30, 6   ;;  %s2619_s24 = smov %s2115_s25 }
 0x2db   : > { %s2620_s25 = smov %s2119_s26  ;;  %s2621_s26 = smov %s2204_s10 }
 0x2dc   : > { %s2622_s27 = smov %s2193_s30  ;;  %19 = sbr.rel (!%p17_p2) target bundleno = 3 (0x3), region = 83 }
 0x2e1   :  { %1445 = vsyncpa [#allocation3], 1 }
 0x2e2   :  { %1447 = vsyncpa [#allocation3 + $0x1], 1 }

</bundles_post_ra>
